<compile_context>
chip_gen: v7x
topology: tpu7x:2x2x1
jax: 0.10.0
libtpu: 0.0.40
codegen_flags: <defaults>
</compile_context>

<pallas_src>
import functools

import jax
import jax.numpy as jnp
from jax.experimental import pallas as pl
from jax.experimental.pallas import tpu as pltpu


def _round_up(x: int, m: int) -> int:
    return ((x + m - 1) // m) * m


# ---------------------------------------------------------------------------
# Kernel
# ---------------------------------------------------------------------------
def embedfc_kernel(x_ref, w1_ref, b1_ref, w2_ref, b2_ref, o_ref):
    """One batch tile: h = x @ W1 + b1; g = GELU(h); o = g @ W2 + b2."""
    # x arrives in fp32 straight from HBM; cast to bf16 here (MXU input) so no
    # separate XLA cast/pad pass over x is needed.
    x = x_ref[...].astype(jnp.bfloat16)                       # (TM, K)
    h = jnp.dot(x, w1_ref[...],                               # MXU, fp32 accum
                preferred_element_type=jnp.float32) + b1_ref[...]
    # Exact (erf) GELU in fp32, matching torch.nn.GELU() default.
    inv_sqrt2 = jnp.float32(0.7071067811865476)
    g = 0.5 * h * (1.0 + jax.lax.erf(h * inv_sqrt2))
    o = jnp.dot(g.astype(jnp.bfloat16), w2_ref[...],          # MXU, fp32 accum
                preferred_element_type=jnp.float32) + b2_ref[...]
    o_ref[...] = o.astype(o_ref.dtype)                        # bf16 writeback


# ---------------------------------------------------------------------------
# One-time parameter prep (outside the per-call jit path)
# ---------------------------------------------------------------------------
def prepare_params(w1, b1, w2, b2):
    """Pad emb_dim up to a lane-dense multiple of 128 and cast weights to bf16.

    Zero-padding invariant: the padded b1 columns are ZERO, so h == 0 there,
    GELU(0) == 0, and the (zero) padded rows of W2 contribute nothing to the
    output.  Do not swap GELU for an activation with f(0) != 0, and do not pad
    b1 with non-zero values, without revisiting this.
    """
    emb_dim = w2.shape[1]
    e_pad = _round_up(max(emb_dim, 128), 128)
    d = e_pad - emb_dim
    w1p = jnp.pad(w1.astype(jnp.bfloat16), ((0, 0), (0, d)))
    b1p = jnp.pad(b1.reshape(1, -1).astype(jnp.float32), ((0, 0), (0, d)))
    w2p = jnp.pad(w2.astype(jnp.bfloat16), ((0, d), (0, d)))
    b2p = jnp.pad(b2.reshape(1, -1).astype(jnp.float32), ((0, 0), (0, d)))
    return w1p, b1p, w2p, b2p


# ---------------------------------------------------------------------------
# Tiling / VMEM budgeting
# ---------------------------------------------------------------------------
def _select_tiling(B: int, K: int, e_pad: int):
    """Pick the batch tile TM and an explicit scoped-VMEM limit.

    Budget-driven so it scales from v5e (bandwidth-starved, small scoped VMEM
    default) to v7x (64 MiB/TC): take the biggest TM <= 512 whose buffers fit a
    conservative 24 MiB working set, then request that much (plus headroom,
    min 32 MiB) from the compiler.
    """
    weight_bytes = K * e_pad * 2 + e_pad * e_pad * 2 + 2 * e_pad * 4  # single-buffered

    def step_bytes(tm):
        x_buf = 2 * tm * K * 4        # fp32 x tile, double-buffered
        o_buf = 2 * tm * e_pad * 2    # bf16 out tile, double-buffered
        tmp = 2 * tm * e_pad * 4      # h and g fp32 intermediates
        return x_buf + o_buf + tmp

    budget = 24 * 1024 * 1024
    tm = 512
    while tm > 16 and weight_bytes + step_bytes(tm) > budget:
        tm //= 2
    tm = max(16, min(tm, _round_up(B, 16)))   # never wider than the batch

    needed = weight_bytes + step_bytes(tm)
    vmem_limit = int(min(64 * 1024 * 1024, max(32 * 1024 * 1024, needed * 5 // 4)))
    return tm, vmem_limit


# ---------------------------------------------------------------------------
# Forward
# ---------------------------------------------------------------------------
@functools.partial(
    jax.jit, static_argnames=("input_dim", "emb_dim", "single_buffer_weights"))
def _embed_fc_jit(x, w1p, b1p, w2p, b2p, *, input_dim, emb_dim,
                  single_buffer_weights):
    x2d = x.reshape(-1, input_dim)            # metadata-only for contiguous NCHW
    B = x2d.shape[0]
    K = input_dim
    e_pad = w1p.shape[1]

    TM, vmem_limit = _select_tiling(B, K, e_pad)
    grid = (pl.cdiv(B, TM),)                  # ragged tail handled by Pallas

    # Resident operands: constant (0,0) index_map; single-buffer when supported.
    res_kw = dict(pipeline_mode=pl.Buffered(1)) if single_buffer_weights else {}
    in_specs = [
        pl.BlockSpec((TM, K), lambda i: (i, 0)),                 # x: streamed
        pl.BlockSpec((K, e_pad), lambda i: (0, 0), **res_kw),    # W1: resident
        pl.BlockSpec((1, e_pad), lambda i: (0, 0), **res_kw),    # b1: resident
        pl.BlockSpec((e_pad, e_pad), lambda i: (0, 0), **res_kw),  # W2: resident
        pl.BlockSpec((1, e_pad), lambda i: (0, 0), **res_kw),    # b2: resident
    ]

    cost = pl.CostEstimate(
        flops=2 * B * K * e_pad + 2 * B * e_pad * e_pad,
        transcendentals=B * e_pad,
        bytes_accessed=(x2d.size * 4 + w1p.size * 2 + w2p.size * 2
                        + (b1p.size + b2p.size) * 4 + B * e_pad * 2),
    )

    out = pl.pallas_call(
        embedfc_kernel,
        out_shape=jax.ShapeDtypeStruct((B, e_pad), jnp.bfloat16),
        grid=grid,
        in_specs=in_specs,
        out_specs=pl.BlockSpec((TM, e_pad), lambda i: (i, 0)),
        compiler_params=pltpu.CompilerParams(
            dimension_semantics=("parallel",),   # v7x: split batch grid over 2 TCs
            vmem_limit_bytes=vmem_limit,
        ),
        cost_estimate=cost,
    )(x2d, w1p, b1p, w2p, b2p)

    return out[:, :emb_dim]                    # bf16 (B, emb_dim)


def embed_fc(x, prepped_params, *, input_dim, emb_dim):
    """Public wrapper: tries single-buffered resident weights first, falls back
    to default (double-buffered) BlockSpecs if this JAX build rejects
    pipeline_mode=pl.Buffered(1)."""
    try:
        return _embed_fc_jit(x, *prepped_params, input_dim=input_dim,
                             emb_dim=emb_dim, single_buffer_weights=True)
    except Exception:
        return _embed_fc_jit(x, *prepped_params, input_dim=input_dim,
                             emb_dim=emb_dim, single_buffer_weights=False)


# ---------------------------------------------------------------------------
# Init + reference
# ---------------------------------------------------------------------------
def init_params(key, input_dim, emb_dim):
    """Deterministic init mimicking nn.Linear's uniform(-1/sqrt(fan_in), +)."""
    k1, k2, k3, k4 = jax.random.split(key, 4)
    lim1 = 1.0 / jnp.sqrt(jnp.float32(input_dim))
    lim2 = 1.0 / jnp.sqrt(jnp.float32(emb_dim))
    w1 = jax.random.uniform(k1, (input_dim, emb_dim), jnp.float32, -lim1, lim1)
    b1 = jax.random.uniform(k2, (1, emb_dim), jnp.float32, -lim1, lim1)
    w2 = jax.random.uniform(k3, (emb_dim, emb_dim), jnp.float32, -lim2, lim2)
    b2 = jax.random.uniform(k4, (1, emb_dim), jnp.float32, -lim2, lim2)
    return w1, b1, w2, b2


def reference(x, w1, b1, w2, b2, input_dim):
    x2d = x.reshape(-1, input_dim).astype(jnp.float32)
    h = x2d @ w1 + b1
    g = jax.nn.gelu(h, approximate=False)
    return g @ w2 + b2


if __name__ == "__main__":
    # x is NCHW [2, 4, 16, 16] -> flattened batch=2, input_dim=1024, emb_dim=32.
    N, C, H, W = 2, 4, 16, 16
    input_dim = C * H * W
    emb_dim = 32

    key = jax.random.PRNGKey(0)
    kx, kp = jax.random.split(key)
    x = jax.random.normal(kx, (N, C, H, W), jnp.float32)
    w1, b1, w2, b2 = init_params(kp, input_dim, emb_dim)

    # One-time weight prep (pad + bf16 cast) outside the per-call path.
    prepped = prepare_params(w1, b1, w2, b2)
    prepped = jax.block_until_ready(prepped)

    out = embed_fc(x, prepped, input_dim=input_dim, emb_dim=emb_dim)
    out = jax.block_until_ready(out)

    ref = reference(x, w1, b1, w2, b2, input_dim)
    assert out.shape == (N, emb_dim), out.shape
    out_f32 = out.astype(jnp.float32)
    # Tolerance loosened vs the fp32 reference because MXU inputs and the
    # kernel output are bf16 (fp32 accumulation; GELU is exact erf in fp32).
    assert jnp.allclose(out_f32, ref, atol=5e-2, rtol=5e-2), float(
        jnp.max(jnp.abs(out_f32 - ref))
    )
    print("KERNEL_OK")
</pallas_src>

<mosaic_0001>
module attributes {stable_mosaic.version = 11 : i64} {
  func.func @embedfc_kernel(%arg0: i32, %arg1: memref<16x1024xf32, #tpu.memory_space<vmem>>, %arg2: memref<1024x128xbf16, #tpu.memory_space<vmem>>, %arg3: memref<1x128xf32, #tpu.memory_space<vmem>>, %arg4: memref<128x128xbf16, #tpu.memory_space<vmem>>, %arg5: memref<1x128xf32, #tpu.memory_space<vmem>>, %arg6: memref<16x128xbf16, #tpu.memory_space<vmem>>) attributes {dimension_semantics = [#tpu.dimension_semantics<parallel>], iteration_bounds = array<i64: 1>, scalar_prefetch = 0 : i64, scratch_operands = 0 : i64, tpu.core_type = #tpu.core_type<tc>, window_params = [{transform_indices = @transform_0, window_bounds = array<i64: 16, 1024>}, {pipeline_mode = #tpu.pipeline_mode<synchronous>, transform_indices = @transform_1, window_bounds = array<i64: 1024, 128>}, {pipeline_mode = #tpu.pipeline_mode<synchronous>, transform_indices = @transform_2, window_bounds = array<i64: 1, 128>}, {pipeline_mode = #tpu.pipeline_mode<synchronous>, transform_indices = @transform_3, window_bounds = array<i64: 128, 128>}, {pipeline_mode = #tpu.pipeline_mode<synchronous>, transform_indices = @transform_4, window_bounds = array<i64: 1, 128>}, {transform_indices = @transform_5, window_bounds = array<i64: 16, 128>}]} {
    %c0 = arith.constant 0 : index
    %c0_0 = arith.constant 0 : index
    %0 = vector.load %arg1[%c0, %c0_0] : memref<16x1024xf32, #tpu.memory_space<vmem>>, vector<16x1024xf32>
    %1 = arith.truncf %0 : vector<16x1024xf32> to vector<16x1024xbf16>
    %c0_1 = arith.constant 0 : index
    %c0_2 = arith.constant 0 : index
    %2 = vector.load %arg2[%c0_1, %c0_2] : memref<1024x128xbf16, #tpu.memory_space<vmem>>, vector<1024x128xbf16>
    %cst = arith.constant dense<0.000000e+00> : vector<16x128xf32>
    %3 = tpu.matmul %1, %2, %cst {dimension_numbers = #tpu.dot_dimension_numbers<[1], [0], [0], [1], [0, 0, 1, 1], [], []>} : vector<16x1024xbf16>, vector<1024x128xbf16>, vector<16x128xf32> -> vector<16x128xf32>
    %c0_3 = arith.constant 0 : index
    %c0_4 = arith.constant 0 : index
    %4 = vector.load %arg3[%c0_3, %c0_4] : memref<1x128xf32, #tpu.memory_space<vmem>>, vector<1x128xf32>
    %5 = vector.broadcast %4 : vector<1x128xf32> to vector<16x128xf32>
    %6 = arith.addf %3, %5 : vector<16x128xf32>
    %cst_5 = arith.constant 5.000000e-01 : f32
    %7 = vector.broadcast %cst_5 : f32 to vector<16x128xf32>
    %8 = arith.mulf %7, %6 : vector<16x128xf32>
    %cst_6 = arith.constant 0.707106769 : f32
    %9 = vector.broadcast %cst_6 : f32 to vector<16x128xf32>
    %10 = arith.mulf %6, %9 : vector<16x128xf32>
    %11 = math.erf %10 : vector<16x128xf32>
    %cst_7 = arith.constant 1.000000e+00 : f32
    %12 = vector.broadcast %cst_7 : f32 to vector<16x128xf32>
    %13 = arith.addf %12, %11 : vector<16x128xf32>
    %14 = arith.mulf %8, %13 : vector<16x128xf32>
    %15 = arith.truncf %14 : vector<16x128xf32> to vector<16x128xbf16>
    %c0_8 = arith.constant 0 : index
    %c0_9 = arith.constant 0 : index
    %16 = vector.load %arg4[%c0_8, %c0_9] : memref<128x128xbf16, #tpu.memory_space<vmem>>, vector<128x128xbf16>
    %cst_10 = arith.constant dense<0.000000e+00> : vector<16x128xf32>
    %17 = tpu.matmul %15, %16, %cst_10 {dimension_numbers = #tpu.dot_dimension_numbers<[1], [0], [0], [1], [0, 0, 1, 1], [], []>} : vector<16x128xbf16>, vector<128x128xbf16>, vector<16x128xf32> -> vector<16x128xf32>
    %c0_11 = arith.constant 0 : index
    %c0_12 = arith.constant 0 : index
    %18 = vector.load %arg5[%c0_11, %c0_12] : memref<1x128xf32, #tpu.memory_space<vmem>>, vector<1x128xf32>
    %19 = vector.broadcast %18 : vector<1x128xf32> to vector<16x128xf32>
    %20 = arith.addf %17, %19 : vector<16x128xf32>
    %21 = arith.truncf %20 : vector<16x128xf32> to vector<16x128xbf16>
    %c0_13 = arith.constant 0 : index
    %c0_14 = arith.constant 0 : index
    %22 = vector.load %arg6[%c0_13, %c0_14] : memref<16x128xbf16, #tpu.memory_space<vmem>>, vector<16x128xbf16>
    tpu.vector_store %arg6[%c0_13, %c0_14], %21 {strides = array<i32>} : memref<16x128xbf16, #tpu.memory_space<vmem>>, vector<16x128xbf16>,
    return
  }
  func.func @transform_0(%arg0: i32) -> (i32, i32) {
    %c0_i32 = arith.constant 0 : i32
    %c0_i32_0 = arith.constant 0 : i32
    return %arg0, %c0_i32 : i32, i32
  }
  func.func @transform_1(%arg0: i32) -> (i32, i32) {
    %c0_i32 = arith.constant 0 : i32
    %c0_i32_0 = arith.constant 0 : i32
    %c0_i32_1 = arith.constant 0 : i32
    return %c0_i32, %c0_i32_0 : i32, i32
  }
  func.func @transform_2(%arg0: i32) -> (i32, i32) {
    %c0_i32 = arith.constant 0 : i32
    %c0_i32_0 = arith.constant 0 : i32
    %c0_i32_1 = arith.constant 0 : i32
    return %c0_i32, %c0_i32_0 : i32, i32
  }
  func.func @transform_3(%arg0: i32) -> (i32, i32) {
    %c0_i32 = arith.constant 0 : i32
    %c0_i32_0 = arith.constant 0 : i32
    %c0_i32_1 = arith.constant 0 : i32
    return %c0_i32, %c0_i32_0 : i32, i32
  }
  func.func @transform_4(%arg0: i32) -> (i32, i32) {
    %c0_i32 = arith.constant 0 : i32
    %c0_i32_0 = arith.constant 0 : i32
    %c0_i32_1 = arith.constant 0 : i32
    return %c0_i32, %c0_i32_0 : i32, i32
  }
  func.func @transform_5(%arg0: i32) -> (i32, i32) {
    %c0_i32 = arith.constant 0 : i32
    %c0_i32_0 = arith.constant 0 : i32
    return %arg0, %c0_i32 : i32, i32
  }
}

module attributes {stable_mosaic.version = 11 : i64} {
  func.func @embedfc_kernel(%arg0: i32, %arg1: memref<16x1024xf32, #tpu.memory_space<vmem>>, %arg2: memref<1024x128xbf16, #tpu.memory_space<vmem>>, %arg3: memref<1x128xf32, #tpu.memory_space<vmem>>, %arg4: memref<128x128xbf16, #tpu.memory_space<vmem>>, %arg5: memref<1x128xf32, #tpu.memory_space<vmem>>, %arg6: memref<16x128xbf16, #tpu.memory_space<vmem>>) attributes {dimension_semantics = [#tpu.dimension_semantics<parallel>], iteration_bounds = array<i64: 1>, scalar_prefetch = 0 : i64, scratch_operands = 0 : i64, tpu.core_type = #tpu.core_type<tc>, window_params = [{transform_indices = @transform_0, window_bounds = array<i64: 16, 1024>}, {pipeline_mode = #tpu.pipeline_mode<synchronous>, transform_indices = @transform_1, window_bounds = array<i64: 1024, 128>}, {pipeline_mode = #tpu.pipeline_mode<synchronous>, transform_indices = @transform_2, window_bounds = array<i64: 1, 128>}, {pipeline_mode = #tpu.pipeline_mode<synchronous>, transform_indices = @transform_3, window_bounds = array<i64: 128, 128>}, {pipeline_mode = #tpu.pipeline_mode<synchronous>, transform_indices = @transform_4, window_bounds = array<i64: 1, 128>}, {transform_indices = @transform_5, window_bounds = array<i64: 16, 128>}]} {
    %c0 = arith.constant 0 : index
    %c0_0 = arith.constant 0 : index
    %0 = vector.load %arg1[%c0, %c0_0] : memref<16x1024xf32, #tpu.memory_space<vmem>>, vector<16x1024xf32>
    %1 = arith.truncf %0 : vector<16x1024xf32> to vector<16x1024xbf16>
    %c0_1 = arith.constant 0 : index
    %c0_2 = arith.constant 0 : index
    %2 = vector.load %arg2[%c0_1, %c0_2] : memref<1024x128xbf16, #tpu.memory_space<vmem>>, vector<1024x128xbf16>
    %cst = arith.constant dense<0.000000e+00> : vector<16x128xf32>
    %3 = tpu.matmul %1, %2, %cst {dimension_numbers = #tpu.dot_dimension_numbers<[1], [0], [0], [1], [0, 0, 1, 1], [], []>} : vector<16x1024xbf16>, vector<1024x128xbf16>, vector<16x128xf32> -> vector<16x128xf32>
    %c0_3 = arith.constant 0 : index
    %c0_4 = arith.constant 0 : index
    %4 = vector.load %arg3[%c0_3, %c0_4] : memref<1x128xf32, #tpu.memory_space<vmem>>, vector<1x128xf32>
    %5 = vector.broadcast %4 : vector<1x128xf32> to vector<16x128xf32>
    %6 = arith.addf %3, %5 : vector<16x128xf32>
    %cst_5 = arith.constant 5.000000e-01 : f32
    %7 = vector.broadcast %cst_5 : f32 to vector<16x128xf32>
    %8 = arith.mulf %7, %6 : vector<16x128xf32>
    %cst_6 = arith.constant 0.707106769 : f32
    %9 = vector.broadcast %cst_6 : f32 to vector<16x128xf32>
    %10 = arith.mulf %6, %9 : vector<16x128xf32>
    %11 = math.erf %10 : vector<16x128xf32>
    %cst_7 = arith.constant 1.000000e+00 : f32
    %12 = vector.broadcast %cst_7 : f32 to vector<16x128xf32>
    %13 = arith.addf %12, %11 : vector<16x128xf32>
    %14 = arith.mulf %8, %13 : vector<16x128xf32>
    %15 = arith.truncf %14 : vector<16x128xf32> to vector<16x128xbf16>
    %c0_8 = arith.constant 0 : index
    %c0_9 = arith.constant 0 : index
    %16 = vector.load %arg4[%c0_8, %c0_9] : memref<128x128xbf16, #tpu.memory_space<vmem>>, vector<128x128xbf16>
    %cst_10 = arith.constant dense<0.000000e+00> : vector<16x128xf32>
    %17 = tpu.matmul %15, %16, %cst_10 {dimension_numbers = #tpu.dot_dimension_numbers<[1], [0], [0], [1], [0, 0, 1, 1], [], []>} : vector<16x128xbf16>, vector<128x128xbf16>, vector<16x128xf32> -> vector<16x128xf32>
    %c0_11 = arith.constant 0 : index
    %c0_12 = arith.constant 0 : index
    %18 = vector.load %arg5[%c0_11, %c0_12] : memref<1x128xf32, #tpu.memory_space<vmem>>, vector<1x128xf32>
    %19 = vector.broadcast %18 : vector<1x128xf32> to vector<16x128xf32>
    %20 = arith.addf %17, %19 : vector<16x128xf32>
    %21 = arith.truncf %20 : vector<16x128xf32> to vector<16x128xbf16>
    %c0_13 = arith.constant 0 : index
    %c0_14 = arith.constant 0 : index
    %22 = vector.load %arg6[%c0_13, %c0_14] : memref<16x128xbf16, #tpu.memory_space<vmem>>, vector<16x128xbf16>
    tpu.vector_store %arg6[%c0_13, %c0_14], %21 {strides = array<i32>} : memref<16x128xbf16, #tpu.memory_space<vmem>>, vector<16x128xbf16>,
    return
  }
  func.func @transform_0(%arg0: i32) -> (i32, i32) {
    %c0_i32 = arith.constant 0 : i32
    %c0_i32_0 = arith.constant 0 : i32
    return %arg0, %c0_i32 : i32, i32
  }
  func.func @transform_1(%arg0: i32) -> (i32, i32) {
    %c0_i32 = arith.constant 0 : i32
    %c0_i32_0 = arith.constant 0 : i32
    %c0_i32_1 = arith.constant 0 : i32
    return %c0_i32, %c0_i32_0 : i32, i32
  }
  func.func @transform_2(%arg0: i32) -> (i32, i32) {
    %c0_i32 = arith.constant 0 : i32
    %c0_i32_0 = arith.constant 0 : i32
    %c0_i32_1 = arith.constant 0 : i32
    return %c0_i32, %c0_i32_0 : i32, i32
  }
  func.func @transform_3(%arg0: i32) -> (i32, i32) {
    %c0_i32 = arith.constant 0 : i32
    %c0_i32_0 = arith.constant 0 : i32
    %c0_i32_1 = arith.constant 0 : i32
    return %c0_i32, %c0_i32_0 : i32, i32
  }
  func.func @transform_4(%arg0: i32) -> (i32, i32) {
    %c0_i32 = arith.constant 0 : i32
    %c0_i32_0 = arith.constant 0 : i32
    %c0_i32_1 = arith.constant 0 : i32
    return %c0_i32, %c0_i32_0 : i32, i32
  }
  func.func @transform_5(%arg0: i32) -> (i32, i32) {
    %c0_i32 = arith.constant 0 : i32
    %c0_i32_0 = arith.constant 0 : i32
    return %arg0, %c0_i32 : i32, i32
  }
}

</mosaic_0001>

<bundles_post_ra>
// kernel: _embed_fc_jit.1
= control target key start
LH: loop header
LB: loop body
LE: loop exit
PB: predicated region body
PF: predicated region fallthrough
CT: control target
= control target key end

     0   :  { %10 = vsyncpa [#allocation3], 0  ;;  %s1644_s0 = inlined_call_operand.vmem [shape: f32[2,1024], index: 0, kind: input, shape index: {}]   ;;  %s1645_s1 = inlined_call_operand.hbm [shape: bf16[1024,128], index: 1, kind: input, shape index: {}]   ;;  %s1646_s2 = inlined_call_operand.vmem [shape: f32[1,128], index: 2, kind: input, shape index: {}]   ;;  %s1647_s3 = inlined_call_operand.vmem [shape: bf16[128,128], index: 3, kind: input, shape index: {}]   ;;  %s1648_s4 = inlined_call_operand.vmem [shape: f32[1,128], index: 4, kind: input, shape index: {}]   ;;  %s1649_s5 = inlined_call_operand.hbm [shape: bf16[2,128], index: 5, kind: output, shape index: {}]  }
   0x1   :  { %11 = vsyncpa [#allocation4], 0  ;;  %s1480_s18 = smov [#allocation2]   ;;  %s1432_s22 = scalar_lea.hbm %s1645_s1, 8192 }
   0x2   :  { %s19_s19 = sshll.u32 %s1480_s18, 4  ;;  %p1433_p0 = scmp.ne.s32.totalorder %s1645_s1, %s1432_s22  ;;  %s20_s19 = int_to_ptr.vmem [resolvable:$true] %s19_s19 }
   0x3   :  { %p1436_p1 = scmp.lt.u32.totalorder %s1432_s22, %s1645_s1 }
   0x5   :  { %p1438_p2 = pnand %p1436_p1, %p1433_p0 }
   0x7   :  { %1441 = shalt.err (!%p1438_p2)
}
   0x8   :  { %s1442_s27 = scalar_lea.vmem %s20_s19, 8192  ;;  %p1447_p4 = scmp.lt.s32.totalorder %s20_s19, %s20_s19 }
   0x9   :  { %p1443_p3 = scmp.ne.s32.totalorder %s20_s19, %s1442_s27  ;;  %p1448_p5 = scmp.lt.s32.totalorder %s1442_s27, %s1442_s27 }
   0xb   :  { %p1449_p6 = por %p1448_p5, %p1447_p4 }
   0xd   :  { %p1450_p7 = pnand %p1449_p6, %p1443_p3 }
   0xf   :  { %1453 = shalt.err (!%p1450_p7)
}
  0x10   :  { %s1481_s28 = smov 64   ;;  %s1482_s29 = smov 4  }
  0x11   :  { %25 = dma.hbm_to_vmem [thread:$0]  %s1645_s1, 8192, %s20_s19, [#allocation3], %s1481_s28, %s1481_s28, %s1482_s29  }
  0x12   :  { %1476 = dma.done.wait [#allocation3], 8192  }
  0x13   :  { %1477 = vsyncadd [#allocation3], 4294959104  ;;  %v1332_v0 = vld [vmem:[#allocation2 + $0x40] sm:$0xff]   ;;  %v1336_v4 = vld [vmem:[#allocation2 + $0x48] sm:$0xff]   ;;  %v1483_v25 = vmov 1983009808   ;;  %v75_v27 = vlaneseq }
  0x14   :  { %v1333_v1 = vld [vmem:[#allocation2 + $0xc0] sm:$0xff]   ;;  %1205 = vmatprep.subr.bf16.mxu0 %v1332_v0  ;;  %v1337_v5 = vld [vmem:[#allocation2 + $0xc8] sm:$0xff]   ;;  %v1340_v8 = vld [vmem:[#allocation2 + $0x50] sm:$0xff]   ;;  %v73_v26 = vunpack.c.l.s4 %v1483_v25  ;;  %vm1485_vm0 = vmmov 0  }
  0x15   :  { %v1334_v2 = vld [vmem:[#allocation2] sm:$0xff]   ;;  %1227 = vmatprep.subr.bf16.mxu1 %v1333_v1  ;;  %v1338_v6 = vld [vmem:[#allocation2 + $0x8] sm:$0xff]   ;;  %v1341_v9 = vld [vmem:[#allocation2 + $0xd0] sm:$0xff]   ;;  %v1532_v33 = vshrl.u32 %v75_v27, 7 }
  0x16   :  { %v1335_v3 = vld [vmem:[#allocation2 + $0x80] sm:$0xff]   ;;  %1206 = vmatpush3.bf16.msra.mxu0 %v1334_v2  ;;  %v1339_v7 = vld [vmem:[#allocation2 + $0x88] sm:$0xff]   ;;  %v1342_v10 = vld [vmem:[#allocation2 + $0x10] sm:$0xff]   ;;  %v74_v32 = vunpack.c.0.s8 %v73_v26 }
  0x17   :  { %1228 = vmatpush3.bf16.msra.mxu1 %v1335_v3  ;;  %1207 = vmatprep.subr.bf16.mxu0 %v1336_v4  ;;  %v1343_v11 = vld [vmem:[#allocation2 + $0x90] sm:$0xff]   ;;  %v1344_v12 = vld [vmem:[#allocation2 + $0x58] sm:$0xff]   ;;  %v1348_v16 = vld [vmem:[#allocation2 + $0x60] sm:$0xff]  }
  0x18   :  { %1229 = vmatprep.subr.bf16.mxu1 %v1337_v5  ;;  %v1345_v13 = vld [vmem:[#allocation2 + $0xd8] sm:$0xff]   ;;  %v1349_v17 = vld [vmem:[#allocation2 + $0xe0] sm:$0xff]   ;;  %v1352_v20 = vld [vmem:[#allocation2 + $0x68] sm:$0xff]   ;;  %v1535_v37 = vsub.s32 %v74_v32, %v1532_v33 }
  0x19   :  { %v1346_v14 = vld [vmem:[#allocation2 + $0x18] sm:$0xff]   ;;  %v1350_v18 = vld [vmem:[#allocation2 + $0x20] sm:$0xff]   ;;  %v1353_v21 = vld [vmem:[#allocation2 + $0xe8] sm:$0xff]  }
  0x1a   :  { %1208 = vmatpush3.bf16.msra.mxu0 %v1338_v6  ;;  %v1347_v15 = vld [vmem:[#allocation2 + $0x98] sm:$0xff]   ;;  %v1351_v19 = vld [vmem:[#allocation2 + $0xa0] sm:$0xff]   ;;  %v1354_v22 = vld [vmem:[#allocation2 + $0x28] sm:$0xff]  }
  0x1b   :  { %1230 = vmatpush3.bf16.msra.mxu1 %v1339_v7  ;;  %1209 = vmatprep.subr.bf16.mxu0 %v1340_v8  ;;  %v1355_v23 = vld [vmem:[#allocation2 + $0xa8] sm:$0xff]   ;;  %v1356_v24 = vld [vmem:[#allocation2 + $0x70] sm:$0xff]   ;;  %v1360_v31 = vld [vmem:[#allocation2 + $0x78] sm:$0xff]  }
  0x1c   :  { %1231 = vmatprep.subr.bf16.mxu1 %v1341_v9  ;;  %v1357_v28 = vld [vmem:[#allocation2 + $0xf0] sm:$0xff]   ;;  %v1361_v34 = vld [vmem:[#allocation2 + $0xf8] sm:$0xff]   ;;  %v1376_v53 = vld [vmem:[#allocation2 + $0x140] sm:$0xff]  }
  0x1d   :  { %v1358_v29 = vld [vmem:[#allocation2 + $0x30] sm:$0xff]   ;;  %v1362_v35 = vld [vmem:[#allocation2 + $0x38] sm:$0xff]   ;;  %v1377_v58 = vld [vmem:[#allocation2 + $0x1c0] sm:$0xff]  }
  0x1e   :  { %1210 = vmatpush3.bf16.msra.mxu0 %v1342_v10  ;;  %v1359_v30 = vld [vmem:[#allocation2 + $0xb0] sm:$0xff]   ;;  %v1363_v36 = vld [vmem:[#allocation2 + $0xb8] sm:$0xff]   ;;  %v1378_v62 = vld [vmem:[#allocation2 + $0x100] sm:$0xff]  }
  0x1f   :  { %1232 = vmatpush3.bf16.msra.mxu1 %v1343_v11  ;;  %1211 = vmatprep.subr.bf16.mxu0 %v1344_v12  ;;  %v1364_v38 = vld [vmem:[%s1644_s0] ss:$16 sps:$4 sm:$0xff]   ;;  %v1372_v43 = vld [vmem:[%s1644_s0 + $0x4] ss:$16 sps:$4 sm:$0xff]   ;;  %v1380_v4 = vld [vmem:[#allocation2 + $0x148] sm:$0xff]  }
  0x20   :  { %1233 = vmatprep.subr.bf16.mxu1 %v1345_v13  ;;  %v1366_v39 = vld [vmem:[%s1644_s0 + $0x20] ss:$16 sps:$4 sm:$0xff]   ;;  %v78_v42 = vrot.slane %v1364_v38, %v1535_v37  ;;  %v1373_v44 = vld [vmem:[%s1644_s0 + $0x24] ss:$16 sps:$4 sm:$0xff]   ;;  %v85_v50 = vrot.slane %v1372_v43, %v1535_v37  ;;  %v1381_v7 = vld [vmem:[#allocation2 + $0x1c8] sm:$0xff]  }
  0x21   :  { %v1368_v40 = vld [vmem:[%s1644_s0 + $0x40] ss:$16 sps:$4 sm:$0xff]   ;;  %v1374_v45 = vld [vmem:[%s1644_s0 + $0x44] ss:$16 sps:$4 sm:$0xff]   ;;  %v92_v46 = vrot.slane %v1366_v39, %v1535_v37  ;;  %v99_v51 = vrot.slane %v1373_v44, %v1535_v37  ;;  %v1382_v8 = vld [vmem:[#allocation2 + $0x108] sm:$0xff]  }
  0x22   :  { %1212 = vmatpush3.bf16.msra.mxu0 %v1346_v14  ;;  %v1370_v41 = vld [vmem:[%s1644_s0 + $0x60] ss:$16 sps:$4 sm:$0xff]   ;;  %v150_v47 = vrot.slane %v1368_v40, %v1535_v37  ;;  %v1375_v49 = vld [vmem:[%s1644_s0 + $0x64] ss:$16 sps:$4 sm:$0xff]   ;;  %v157_v52 = vrot.slane %v1374_v45, %v1535_v37  ;;  %v1383_v9 = vld [vmem:[#allocation2 + $0x188] sm:$0xff]  }
  0x23   :  { %1234 = vmatpush3.bf16.msra.mxu1 %v1347_v15  ;;  %1213 = vmatprep.subr.bf16.mxu0 %v1348_v16  ;;  %v164_v48 = vrot.slane %v1370_v41, %v1535_v37  ;;  %v101_v54 = vcombine.high %v78_v42, %v92_v46  ;;  %v171_v56 = vrot.slane %v1375_v49, %v1535_v37  ;;  %v1379_v2 = vld [vmem:[#allocation2 + $0x180] sm:$0xff]   ;;  %v1384_v10 = vld [vmem:[#allocation2 + $0x150] sm:$0xff]   ;;  %v1388_v14 = vld [vmem:[#allocation2 + $0x158] sm:$0xff]  }
  0x24   :  { %1235 = vmatprep.subr.bf16.mxu1 %v1349_v17  ;;  %v100_v57 = vcombine.low %v78_v42, %v92_v46  ;;  %v103_v59 = vcombine.high %v85_v50, %v99_v51  ;;  %v102_v61 = vcombine.low %v85_v50, %v99_v51  ;;  %v1385_v11 = vld [vmem:[#allocation2 + $0x1d0] sm:$0xff]   ;;  %v1389_v15 = vld [vmem:[#allocation2 + $0x1d8] sm:$0xff]   ;;  %v1399_v25 = vld [vmem:[#allocation2 + $0x1a8] sm:$0xff]  }
  0x25   :  { %v173_v55 = vcombine.high %v150_v47, %v164_v48  ;;  %v172_v60 = vcombine.low %v150_v47, %v164_v48  ;;  %v175_v0 = vcombine.high %v157_v52, %v171_v56  ;;  %v174_v1 = vcombine.low %v157_v52, %v171_v56  ;;  %v1386_v12 = vld [vmem:[#allocation2 + $0x110] sm:$0xff]   ;;  %v1390_v16 = vld [vmem:[#allocation2 + $0x118] sm:$0xff]  }
  0x26   :  { %1214 = vmatpush3.bf16.msra.mxu0 %v1350_v18  ;;  %v1387_v13 = vld [vmem:[#allocation2 + $0x190] sm:$0xff]   ;;  %v1391_v17 = vld [vmem:[#allocation2 + $0x198] sm:$0xff]   ;;  %v1392_v18 = vld [vmem:[#allocation2 + $0x160] sm:$0xff]  }
  0x27   :  { %1236 = vmatpush3.bf16.msra.mxu1 %v1351_v19  ;;  %1215 = vmatprep.subr.bf16.mxu0 %v1352_v20  ;;  %v229_v63 = vpack.c.bf16 %v173_v55, %v101_v54  ;;  %v228_v3 = vpack.c.bf16 %v172_v60, %v100_v57  ;;  %v231_v5 = vpack.c.bf16 %v175_v0, %v103_v59  ;;  %v1393_v19 = vld [vmem:[#allocation2 + $0x1e0] sm:$0xff]   ;;  %v1400_v26 = vld [vmem:[#allocation2 + $0x170] sm:$0xff]   ;;  %v1406_v32 = vld [vmem:[#allocation2 + $0x138] sm:$0xff]  }
  0x28   :  { %1237 = vmatprep.subr.bf16.mxu1 %v1353_v21  ;;  %v230_v6 = vpack.c.bf16 %v174_v1, %v102_v61  ;;  %v1394_v20 = vld [vmem:[#allocation2 + $0x120] sm:$0xff]   ;;  %v1401_v27 = vld [vmem:[#allocation2 + $0x1f0] sm:$0xff]   ;;  %v1412_v38 = vld [vmem:[%s1644_s0 + $0x48] ss:$16 sps:$4 sm:$0xff]  }
  0x29   :  { %787 = vmatprep.mubr.bf16.mxu0 %v229_v63  ;;  %828 = vmatprep.mubr.bf16.mxu1 %v231_v5  ;;  %v1395_v21 = vld [vmem:[#allocation2 + $0x1a0] sm:$0xff]   ;;  %v1414_v39 = vld [vmem:[%s1644_s0 + $0x68] ss:$16 sps:$4 sm:$0xff]   ;;  %v1416_v40 = vld [vmem:[%s1644_s0 + $0xc] ss:$16 sps:$4 sm:$0xff]   ;;  %v186_v44 = vrot.slane %v1412_v38, %v1535_v37 }
  0x2a   :  { %1216 = vmatpush3.bf16.msra.mxu0 %v1354_v22  ;;  %v1396_v22 = vld [vmem:[#allocation2 + $0x168] sm:$0xff]   ;;  %v200_v47 = vrot.slane %v1414_v39, %v1535_v37  ;;  %v121_v48 = vrot.slane %v1416_v40, %v1535_v37  ;;  %v1420_v0 = vld [vmem:[%s1647_s3] sm:$0xff]  }
  0x2b   :  { %1238 = vmatpush3.bf16.msra.mxu1 %v1355_v23  ;;  %1217 = vmatprep.subr.bf16.mxu0 %v1356_v24  ;;  %v1397_v23 = vld [vmem:[#allocation2 + $0x1e8] sm:$0xff]  }
  0x2c   :  { %1239 = vmatprep.subr.bf16.mxu1 %v1357_v28  ;;  %v1398_v24 = vld [vmem:[#allocation2 + $0x128] sm:$0xff]   ;;  %v1402_v28 = vld [vmem:[#allocation2 + $0x130] sm:$0xff]   ;;  %v209_v54 = vcombine.high %v186_v44, %v200_v47  ;;  %v208_v56 = vcombine.low %v186_v44, %v200_v47 }
  0x2d   :  { %v1417_v41 = vld [vmem:[%s1644_s0 + $0x2c] ss:$16 sps:$4 sm:$0xff]  }
  0x2e   :  { %1218 = vmatpush3.bf16.msra.mxu0 %v1358_v29  ;;  %v1403_v29 = vld [vmem:[#allocation2 + $0x1b0] sm:$0xff]   ;;  %v1418_v45 = vld [vmem:[%s1644_s0 + $0x4c] ss:$16 sps:$4 sm:$0xff]   ;;  %v135_v49 = vrot.slane %v1417_v41, %v1535_v37 }
  0x2f   :  { %1240 = vmatpush3.bf16.msra.mxu1 %v1359_v30  ;;  %1219 = vmatprep.subr.bf16.mxu0 %v1360_v31  ;;  %v1404_v30 = vld [vmem:[#allocation2 + $0x178] sm:$0xff]   ;;  %v193_v51 = vrot.slane %v1418_v45, %v1535_v37  ;;  %v1421_v1 = vld [vmem:[%s1647_s3 + $0x8] sm:$0xff]  }
  0x30   :  { %1241 = vmatprep.subr.bf16.mxu1 %v1361_v34  ;;  %v1405_v31 = vld [vmem:[#allocation2 + $0x1f8] sm:$0xff]   ;;  %v139_v55 = vcombine.high %v121_v48, %v135_v49  ;;  %v138_v57 = vcombine.low %v121_v48, %v135_v49  ;;  %v1425_v5 = vld [vmem:[%s1647_s3 + $0x28] sm:$0xff]  }
  0x31   :  { %v1407_v34 = vld [vmem:[#allocation2 + $0x1b8] sm:$0xff]  }
  0x32   :  { %1220 = vmatpush3.bf16.msra.mxu0 %v1362_v35  ;;  %v1408_v35 = vld [vmem:[%s1644_s0 + $0x8] ss:$16 sps:$4 sm:$0xff]   ;;  %v1419_v46 = vld [vmem:[%s1644_s0 + $0x6c] ss:$16 sps:$4 sm:$0xff]  }
  0x33   :  { %1242 = vmatpush3.bf16.msra.mxu1 %v1363_v36  ;;  %1249 = vmatprep.subr.bf16.mxu0 %v1376_v53  ;;  %v1410_v36 = vld [vmem:[%s1644_s0 + $0x28] ss:$16 sps:$4 sm:$0xff]   ;;  %v114_v42 = vrot.slane %v1408_v35, %v1535_v37  ;;  %v207_v52 = vrot.slane %v1419_v46, %v1535_v37 }
  0x34   :  { %1271 = vmatprep.subr.bf16.mxu1 %v1377_v58  ;;  %v128_v43 = vrot.slane %v1410_v36, %v1535_v37  ;;  %v1484_v37 = vmov 0.0  }
  0x35   :  { %788 = vmatmul.mubr.bf16.vlgmr.msra.gmra.mrb[0].mxu0 %v228_v3  ;;  %v211_v58 = vcombine.high %v193_v51, %v207_v52  ;;  %v210_v59 = vcombine.low %v193_v51, %v207_v52  ;;  %v1423_v3 = vld [vmem:[%s1647_s3 + $0x18] sm:$0xff]  }
  0x36   :  { %1250 = vmatpush3.bf16.msra.mxu0 %v1378_v62  ;;  %829 = vmatmul.mubr.bf16.vlgmr.msra.gmra.mrb[0].mxu1 %v230_v6  ;;  %v137_v50 = vcombine.high %v114_v42, %v128_v43  ;;  %v136_v53 = vcombine.low %v114_v42, %v128_v43  ;;  %v1426_v6 = vld [vmem:[%s1647_s3 + $0x30] sm:$0xff]  }
  0x37   :  { %1251 = vmatprep.subr.bf16.mxu0 %v1380_v4  ;;  %1272 = vmatpush3.bf16.msra.mxu1 %v1379_v2  ;;  %v235_v62 = vpack.c.bf16 %v211_v58, %v139_v55  ;;  %v234_v63 = vpack.c.bf16 %v210_v59, %v138_v57  ;;  %v1422_v2 = vld [vmem:[%s1647_s3 + $0x10] sm:$0xff]   ;;  %v1424_v4 = vld [vmem:[%s1647_s3 + $0x20] sm:$0xff]  }
  0x38   :  { %1273 = vmatprep.subr.bf16.mxu1 %v1381_v7  ;;  %v233_v60 = vpack.c.bf16 %v209_v54, %v137_v50  ;;  %v232_v61 = vpack.c.bf16 %v208_v56, %v136_v53  ;;  %v1427_v7 = vld [vmem:[%s1647_s3 + $0x38] sm:$0xff]   ;;  %v1486_v54 = vmov 1966171168   ;;  %v1191_v57 = vld [vmem:[%s1648_s4] ss:$0 sm:$0xff] }
  0x39   :  { %910 = vmatprep.mubr.bf16.mxu1 %v235_v62  ;;  %v1046_v55 = vunpack.c.l.s4 %v1486_v54 }
  0x3a   :  { %1252 = vmatpush3.bf16.msra.mxu0 %v1382_v8  ;;  %869 = vmatprep.mubr.bf16.mxu0 %v233_v60 }
  0x3b   :  { %1253 = vmatprep.subr.bf16.mxu0 %v1384_v10  ;;  %1274 = vmatpush3.bf16.msra.mxu1 %v1383_v9  ;;  %v1126_v9 = vld [vmem:[%s1646_s2] ss:$0 sm:$0xff]  ;;  %v1047_v56 = vunpack.c.0.s8 %v1046_v55 }
  0x3c   :  { %1275 = vmatprep.subr.bf16.mxu1 %v1385_v11 }
  0x3e   :  { %1254 = vmatpush3.bf16.msra.mxu0 %v1386_v12 }
  0x3f   :  { %1255 = vmatprep.subr.bf16.mxu0 %v1388_v14  ;;  %1276 = vmatpush3.bf16.msra.mxu1 %v1387_v13 }
  0x40   :  { %1277 = vmatprep.subr.bf16.mxu1 %v1389_v15 }
  0x42   :  { %1256 = vmatpush3.bf16.msra.mxu0 %v1390_v16 }
  0x43   :  { %1257 = vmatprep.subr.bf16.mxu0 %v1392_v18  ;;  %1278 = vmatpush3.bf16.msra.mxu1 %v1391_v17 }
  0x44   :  { %1279 = vmatprep.subr.bf16.mxu1 %v1393_v19 }
  0x46   :  { %1258 = vmatpush3.bf16.msra.mxu0 %v1394_v20 }
  0x47   :  { %1259 = vmatprep.subr.bf16.mxu0 %v1396_v22  ;;  %1280 = vmatpush3.bf16.msra.mxu1 %v1395_v21 }
  0x48   :  { %1281 = vmatprep.subr.bf16.mxu1 %v1397_v23 }
  0x4a   :  { %1260 = vmatpush3.bf16.msra.mxu0 %v1398_v24 }
  0x4b   :  { %1261 = vmatprep.subr.bf16.mxu0 %v1400_v26  ;;  %1282 = vmatpush3.bf16.msra.mxu1 %v1399_v25 }
  0x4c   :  { %1283 = vmatprep.subr.bf16.mxu1 %v1401_v27 }
  0x4e   :  { %1262 = vmatpush3.bf16.msra.mxu0 %v1402_v28 }
  0x4f   :  { %1263 = vmatprep.subr.bf16.mxu0 %v1404_v30  ;;  %1284 = vmatpush3.bf16.msra.mxu1 %v1403_v29 }
  0x50   :  { %1285 = vmatprep.subr.bf16.mxu1 %v1405_v31 }
  0x52   :  { %1264 = vmatpush3.bf16.msra.mxu0 %v1406_v32 }
  0x53   :  { %1286 = vmatpush3.bf16.msra.mxu1 %v1407_v34  ;;  %1302 = vmatprep.subr.bf16.mxu0 %v1484_v37 }
  0x55   :  { %870 = vmatmul.mubr.bf16.vlgmr.msra.gmra.mrb[4].mxu0 %v232_v61 }
  0x56   :  { %911 = vmatmul.mubr.bf16.vlgmr.msra.gmra.mrb[4].mxu1 %v234_v63  ;;  %1303 = vmatpush3.bf16.msra.mxu0 %v1420_v0  ;;  %v1050_v63 = vsub.s32 %v1047_v56, %v1532_v33 }
  0x57   :  { %1304 = vmatprep.subr.bf16.mxu0 %v1484_v37  ;;  %1318 = vmatprep.mubr.msk.bf16.mxu0 %vm1485_vm0, %v1484_v37 }
  0x5a   :  { %1305 = vmatpush3.bf16.msra.mxu0 %v1421_v1 }
  0x5b   :  { %1306 = vmatprep.subr.bf16.mxu0 %v1484_v37 }
  0x5e   :  { %1307 = vmatpush3.bf16.msra.mxu0 %v1422_v2 }
  0x5f   :  { %1308 = vmatprep.subr.bf16.mxu0 %v1484_v37 }
  0x62   :  { %1309 = vmatpush3.bf16.msra.mxu0 %v1423_v3 }
  0x63   :  { %1310 = vmatprep.subr.bf16.mxu0 %v1484_v37 }
  0x66   :  { %1311 = vmatpush3.bf16.msra.mxu0 %v1424_v4 }
  0x67   :  { %1312 = vmatprep.subr.bf16.mxu0 %v1484_v37 }
  0x6a   :  { %1313 = vmatpush3.bf16.msra.mxu0 %v1425_v5 }
  0x6b   :  { %1314 = vmatprep.subr.bf16.mxu0 %v1484_v37 }
  0x6e   :  { %1315 = vmatpush3.bf16.msra.mxu0 %v1426_v6 }
  0x6f   :  { %1316 = vmatprep.subr.bf16.mxu0 %v1484_v37 }
  0x72   :  { %1317 = vmatpush3.bf16.msra.mxu0 %v1427_v7 }
 0x108   :  { %v1221_v8 = vpop.f32.mrb[0].mxu0 }
 0x109   :  { %v1222_v10 = vpop.f32.mrb[1].mxu0  ;;  %v1243_v11 = vpop.f32.mrb[0].mxu1 }
 0x10a   :  { %v1223_v12 = vadd.f32 %v1222_v10, %v1221_v8  ;;  %v1224_v13 = vpop.f32.mrb[2].mxu0  ;;  %v1244_v14 = vpop.f32.mrb[1].mxu1 }
 0x10b   :  { %v1225_v15 = vpop.f32.mrb[3].mxu0  ;;  %v1245_v17 = vadd.f32 %v1244_v14, %v1243_v11  ;;  %v1246_v18 = vpop.f32.mrb[2].mxu1 }
 0x10c   :  { %v790_v16 = vadd.f32 %v1223_v12, %v1126_v9  ;;  %v1226_v19 = vadd.f32 %v1225_v15, %v1224_v13  ;;  %v1247_v20 = vpop.f32.mrb[3].mxu1 }
 0x10d   :  { %v1248_v23 = vadd.f32 %v1247_v20, %v1246_v18 }
 0x10e   :  { %v831_v21 = vadd.f32 %v1245_v17, %v790_v16  ;;  %v793_v22 = vadd.f32 %v1226_v19, %v1126_v9 }
 0x110   :  { %v834_v24 = vadd.f32 %v1248_v23, %v793_v22 }
 0x128   :  { %v1265_v25 = vpop.f32.mrb[4].mxu0 }
 0x129   :  { %v1287_v26 = vpop.f32.mrb[4].mxu1  ;;  %v1266_v27 = vpop.f32.mrb[5].mxu0 }
 0x12a   :  { %v1267_v28 = vadd.f32 %v1266_v27, %v1265_v25  ;;  %v1288_v29 = vpop.f32.mrb[5].mxu1  ;;  %v1268_v30 = vpop.f32.mrb[6].mxu0 }
 0x12b   :  { %v1289_v31 = vadd.f32 %v1288_v29, %v1287_v26  ;;  %v1290_v32 = vpop.f32.mrb[6].mxu1  ;;  %v1269_v34 = vpop.f32.mrb[7].mxu0 }
 0x12c   :  { %v872_v35 = vadd.f32 %v1267_v28, %v831_v21  ;;  %v1270_v36 = vadd.f32 %v1269_v34, %v1268_v30  ;;  %v1291_v38 = vpop.f32.mrb[7].mxu1 }
 0x12d   :  { %v1292_v39 = vadd.f32 %v1291_v38, %v1290_v32 }
 0x12e   :  { %v913_v40 = vadd.f32 %v1289_v31, %v872_v35  ;;  %v875_v41 = vadd.f32 %v1270_v36, %v834_v24 }
 0x130   :  { %v921_v42 = vmul.f32 0.70710677, %v913_v40  ;;  %v916_v43 = vadd.f32 %v1292_v39, %v875_v41  ;;  %v919_v48 = vmul.f32 0.5, %v913_v40 }
 0x132   :  { %1428 = verf.f32 %v921_v42  ;;  %v922_v44 = vmul.f32 0.70710677, %v916_v43  ;;  %v920_v49 = vmul.f32 0.5, %v916_v43 }
 0x134   :  { %1430 = verf.f32 %v922_v44 }
 0x13c   :  { %v1429_v45 = vpop.eup %1428 }
 0x13d   :  { %v925_v46 = vadd.f32 1.0, %v1429_v45 }
 0x13e   :  { %v1431_v47 = vpop.eup %1430 }
 0x13f   :  { %v926_v50 = vadd.f32 1.0, %v1431_v47  ;;  %v927_v51 = vmul.f32 %v925_v46, %v919_v48 }
 0x141   :  { %v928_v52 = vmul.f32 %v926_v50, %v920_v49 }
 0x143   :  { %v929_v53 = vpack.c.bf16 %v928_v52, %v927_v51 }
 0x145   :  { %1319 = vmatmul.mubr.bf16.vlgmr.msra.gmra.mrb[8].mxu0 %v929_v53 }
 0x218   :  { %v1035_v58 = vpop.f32.mrb[8].mxu0 }
 0x219   :  { %v1320_v59 = vpop.f32.mrb[9].mxu0  ;;  %v1036_v61 = vadd.f32 %v1191_v57, %v1035_v58 }
 0x21a   :  { %v1038_v60 = vpop.f32.mrb[10].mxu0 }
 0x21b   :  { %v1039_v62 = vadd.f32 %v1191_v57, %v1038_v60  ;;  %v1321_v0 = vpop.f32.mrb[11].mxu0 }
 0x21d   :  { %v1042_v37 = vpack.c.bf16 %v1039_v62, %v1036_v61  ;;  %v1200_v1 = vpack.c.bf16 %v1039_v62, %v1039_v62 }
 0x21f   :  { %v1051_v2 = vrot.slane %v1042_v37, %v1050_v63  ;;  %v1058_v3 = vrot.slane %v1200_v1, %v1050_v63 }
 0x221   :  { %v1059_v4 = vcombine.high %v1051_v2, %v1051_v2  ;;  %v1060_v5 = vcombine.high %v1058_v3, %v1058_v3  ;;  %v1067_v6 = vrot.slane %v1051_v2, %v1050_v63  ;;  %v1074_v7 = vrot.slane %v1058_v3, %v1050_v63  ;;  %1201 = vst.sshfl [vmem:[#allocation5] sm:$0x1 pattern:$0x73625140] %v1051_v2 }
 0x222   :  { %1203 = vst.sshfl [vmem:[#allocation5 + $0x4] sm:$0x1 pattern:$0x73625140] %v1058_v3 }
 0x223   :  { %v1081_v8 = vrot.slane %v1059_v4, %v1050_v63  ;;  %v1088_v9 = vrot.slane %v1060_v5, %v1050_v63  ;;  %v1089_v10 = vcombine.high %v1067_v6, %v1067_v6  ;;  %v1090_v11 = vcombine.high %v1074_v7, %v1074_v7  ;;  %1202 = vst.sshfl [vmem:[#allocation5 + $0x1] sm:$0x1 pattern:$0x73625140] %v1059_v4 }
 0x224   :  { %1204 = vst.sshfl [vmem:[#allocation5 + $0x5] sm:$0x1 pattern:$0x73625140] %v1060_v5 }
 0x225   :  { %v1091_v12 = vcombine.high %v1081_v8, %v1081_v8  ;;  %v1092_v13 = vcombine.high %v1088_v9, %v1088_v9  ;;  %1103 = vst [vmem:[#allocation5 + $0x2] sm:$0x1] %v1089_v10  ;;  %1107 = vst [vmem:[#allocation5 + $0x6] sm:$0x1] %v1090_v11 }
 0x227   :  { %1104 = vst [vmem:[#allocation5 + $0x3] sm:$0x1] %v1091_v12  ;;  %1108 = vst [vmem:[#allocation5 + $0x7] sm:$0x1] %v1092_v13 }
 0x228   :  { %1113 = vsyncadd [#allocation4], 112  ;;  %s1487_s4 = smov [#allocation5]  }
 0x229   :  { %s1114_s29 = sshll.u32 %s1487_s4, 4  ;;  %s1115_s29 = int_to_ptr.vmem [resolvable:$true] %s1114_s29 }
 0x22a   :  { %s1454_s30 = scalar_lea.vmem %s1115_s29, 16  ;;  %s1458_s6 = scalar_lea.vmem %s1115_s29, 128 }
 0x22b   :  { %p1455_p8 = scmp.ne.s32.totalorder %s1115_s29, %s1454_s30  ;;  %p1459_p9 = scmp.lt.s32.totalorder %s1115_s29, %s1115_s29 }
 0x22c   :  { %p1460_p10 = scmp.lt.s32.totalorder %s1458_s6, %s1454_s30 }
 0x22e   :  { %p1461_p11 = por %p1460_p10, %p1459_p9 }
 0x230   :  { %p1462_p12 = pnand %p1461_p11, %p1455_p8 }
 0x232   :  { %1465 = shalt.err (!%p1462_p12)
}
 0x233   :  { %s1466_s8 = scalar_lea.hbm %s1649_s5, 16 }
 0x234   :  { %p1467_p13 = scmp.ne.s32.totalorder %s1649_s5, %s1466_s8  ;;  %p1470_p0 = scmp.lt.u32.totalorder %s1466_s8, %s1649_s5 }
 0x236   :  { %p1472_p1 = pnand %p1470_p0, %p1467_p13 }
 0x238   :  { %1475 = shalt.err (!%p1472_p1)
}
 0x239   :  { %s1488_s12 = smov 16   ;;  %s1489_s13 = smov 1  }
 0x23a   :  { %1120 = dma.vmem_to_hbm [thread:$0]  %s1115_s29, 16, %s1649_s5, [#allocation4], %s1488_s12, %s1488_s12, %s1489_s13  }
 0x23b   :  { %1478 = dma.done.wait [#allocation4], 128  }
 0x23c   :  { %1479 = vsyncadd [#allocation4], 4294967168 }
 0x23d   :  { %1124 = vsyncpa [#allocation3], 1 }
 0x23e   :  { %1125 = vsyncpa [#allocation4], 1 }

// kernel: _embed_fc_jit.1
= control target key start
LH: loop header
LB: loop body
LE: loop exit
PB: predicated region body
PF: predicated region fallthrough
CT: control target
= control target key end

     0   :  { %10 = vsyncpa [#allocation3], 0  ;;  %s1644_s0 = inlined_call_operand.vmem [shape: f32[2,1024], index: 0, kind: input, shape index: {}]   ;;  %s1645_s1 = inlined_call_operand.hbm [shape: bf16[1024,128], index: 1, kind: input, shape index: {}]   ;;  %s1646_s2 = inlined_call_operand.vmem [shape: f32[1,128], index: 2, kind: input, shape index: {}]   ;;  %s1647_s3 = inlined_call_operand.vmem [shape: bf16[128,128], index: 3, kind: input, shape index: {}]   ;;  %s1648_s4 = inlined_call_operand.vmem [shape: f32[1,128], index: 4, kind: input, shape index: {}]   ;;  %s1649_s5 = inlined_call_operand.hbm [shape: bf16[2,128], index: 5, kind: output, shape index: {}]  }
   0x1   :  { %11 = vsyncpa [#allocation4], 0  ;;  %s1480_s18 = smov [#allocation2]   ;;  %s1432_s22 = scalar_lea.hbm %s1645_s1, 8192 }
   0x2   :  { %s19_s19 = sshll.u32 %s1480_s18, 4  ;;  %p1433_p0 = scmp.ne.s32.totalorder %s1645_s1, %s1432_s22  ;;  %s20_s19 = int_to_ptr.vmem [resolvable:$true] %s19_s19 }
   0x3   :  { %p1436_p1 = scmp.lt.u32.totalorder %s1432_s22, %s1645_s1 }
   0x5   :  { %p1438_p2 = pnand %p1436_p1, %p1433_p0 }
   0x7   :  { %1441 = shalt.err (!%p1438_p2)
}
   0x8   :  { %s1442_s27 = scalar_lea.vmem %s20_s19, 8192  ;;  %p1447_p4 = scmp.lt.s32.totalorder %s20_s19, %s20_s19 }
   0x9   :  { %p1443_p3 = scmp.ne.s32.totalorder %s20_s19, %s1442_s27  ;;  %p1448_p5 = scmp.lt.s32.totalorder %s1442_s27, %s1442_s27 }
   0xb   :  { %p1449_p6 = por %p1448_p5, %p1447_p4 }
   0xd   :  { %p1450_p7 = pnand %p1449_p6, %p1443_p3 }
   0xf   :  { %1453 = shalt.err (!%p1450_p7)
}
  0x10   :  { %s1481_s28 = smov 64   ;;  %s1482_s29 = smov 4  }
  0x11   :  { %25 = dma.hbm_to_vmem [thread:$0]  %s1645_s1, 8192, %s20_s19, [#allocation3], %s1481_s28, %s1481_s28, %s1482_s29  }
  0x12   :  { %1476 = dma.done.wait [#allocation3], 8192  }
  0x13   :  { %1477 = vsyncadd [#allocation3], 4294959104  ;;  %v1332_v0 = vld [vmem:[#allocation2 + $0x40] sm:$0xff]   ;;  %v1336_v4 = vld [vmem:[#allocation2 + $0x48] sm:$0xff]   ;;  %v1483_v25 = vmov 1983009808   ;;  %v75_v27 = vlaneseq }
  0x14   :  { %v1333_v1 = vld [vmem:[#allocation2 + $0xc0] sm:$0xff]   ;;  %1205 = vmatprep.subr.bf16.mxu0 %v1332_v0  ;;  %v1337_v5 = vld [vmem:[#allocation2 + $0xc8] sm:$0xff]   ;;  %v1340_v8 = vld [vmem:[#allocation2 + $0x50] sm:$0xff]   ;;  %v73_v26 = vunpack.c.l.s4 %v1483_v25  ;;  %vm1485_vm0 = vmmov 0  }
  0x15   :  { %v1334_v2 = vld [vmem:[#allocation2] sm:$0xff]   ;;  %1227 = vmatprep.subr.bf16.mxu1 %v1333_v1  ;;  %v1338_v6 = vld [vmem:[#allocation2 + $0x8] sm:$0xff]   ;;  %v1341_v9 = vld [vmem:[#allocation2 + $0xd0] sm:$0xff]   ;;  %v1532_v33 = vshrl.u32 %v75_v27, 7 }
  0x16   :  { %v1335_v3 = vld [vmem:[#allocation2 + $0x80] sm:$0xff]   ;;  %1206 = vmatpush3.bf16.msra.mxu0 %v1334_v2  ;;  %v1339_v7 = vld [vmem:[#allocation2 + $0x88] sm:$0xff]   ;;  %v1342_v10 = vld [vmem:[#allocation2 + $0x10] sm:$0xff]   ;;  %v74_v32 = vunpack.c.0.s8 %v73_v26 }
  0x17   :  { %1228 = vmatpush3.bf16.msra.mxu1 %v1335_v3  ;;  %1207 = vmatprep.subr.bf16.mxu0 %v1336_v4  ;;  %v1343_v11 = vld [vmem:[#allocation2 + $0x90] sm:$0xff]   ;;  %v1344_v12 = vld [vmem:[#allocation2 + $0x58] sm:$0xff]   ;;  %v1348_v16 = vld [vmem:[#allocation2 + $0x60] sm:$0xff]  }
  0x18   :  { %1229 = vmatprep.subr.bf16.mxu1 %v1337_v5  ;;  %v1345_v13 = vld [vmem:[#allocation2 + $0xd8] sm:$0xff]   ;;  %v1349_v17 = vld [vmem:[#allocation2 + $0xe0] sm:$0xff]   ;;  %v1352_v20 = vld [vmem:[#allocation2 + $0x68] sm:$0xff]   ;;  %v1535_v37 = vsub.s32 %v74_v32, %v1532_v33 }
  0x19   :  { %v1346_v14 = vld [vmem:[#allocation2 + $0x18] sm:$0xff]   ;;  %v1350_v18 = vld [vmem:[#allocation2 + $0x20] sm:$0xff]   ;;  %v1353_v21 = vld [vmem:[#allocation2 + $0xe8] sm:$0xff]  }
  0x1a   :  { %1208 = vmatpush3.bf16.msra.mxu0 %v1338_v6  ;;  %v1347_v15 = vld [vmem:[#allocation2 + $0x98] sm:$0xff]   ;;  %v1351_v19 = vld [vmem:[#allocation2 + $0xa0] sm:$0xff]   ;;  %v1354_v22 = vld [vmem:[#allocation2 + $0x28] sm:$0xff]  }
  0x1b   :  { %1230 = vmatpush3.bf16.msra.mxu1 %v1339_v7  ;;  %1209 = vmatprep.subr.bf16.mxu0 %v1340_v8  ;;  %v1355_v23 = vld [vmem:[#allocation2 + $0xa8] sm:$0xff]   ;;  %v1356_v24 = vld [vmem:[#allocation2 + $0x70] sm:$0xff]   ;;  %v1360_v31 = vld [vmem:[#allocation2 + $0x78] sm:$0xff]  }
  0x1c   :  { %1231 = vmatprep.subr.bf16.mxu1 %v1341_v9  ;;  %v1357_v28 = vld [vmem:[#allocation2 + $0xf0] sm:$0xff]   ;;  %v1361_v34 = vld [vmem:[#allocation2 + $0xf8] sm:$0xff]   ;;  %v1376_v53 = vld [vmem:[#allocation2 + $0x140] sm:$0xff]  }
  0x1d   :  { %v1358_v29 = vld [vmem:[#allocation2 + $0x30] sm:$0xff]   ;;  %v1362_v35 = vld [vmem:[#allocation2 + $0x38] sm:$0xff]   ;;  %v1377_v58 = vld [vmem:[#allocation2 + $0x1c0] sm:$0xff]  }
  0x1e   :  { %1210 = vmatpush3.bf16.msra.mxu0 %v1342_v10  ;;  %v1359_v30 = vld [vmem:[#allocation2 + $0xb0] sm:$0xff]   ;;  %v1363_v36 = vld [vmem:[#allocation2 + $0xb8] sm:$0xff]   ;;  %v1378_v62 = vld [vmem:[#allocation2 + $0x100] sm:$0xff]  }
  0x1f   :  { %1232 = vmatpush3.bf16.msra.mxu1 %v1343_v11  ;;  %1211 = vmatprep.subr.bf16.mxu0 %v1344_v12  ;;  %v1364_v38 = vld [vmem:[%s1644_s0] ss:$16 sps:$4 sm:$0xff]   ;;  %v1372_v43 = vld [vmem:[%s1644_s0 + $0x4] ss:$16 sps:$4 sm:$0xff]   ;;  %v1380_v4 = vld [vmem:[#allocation2 + $0x148] sm:$0xff]  }
  0x20   :  { %1233 = vmatprep.subr.bf16.mxu1 %v1345_v13  ;;  %v1366_v39 = vld [vmem:[%s1644_s0 + $0x20] ss:$16 sps:$4 sm:$0xff]   ;;  %v78_v42 = vrot.slane %v1364_v38, %v1535_v37  ;;  %v1373_v44 = vld [vmem:[%s1644_s0 + $0x24] ss:$16 sps:$4 sm:$0xff]   ;;  %v85_v50 = vrot.slane %v1372_v43, %v1535_v37  ;;  %v1381_v7 = vld [vmem:[#allocation2 + $0x1c8] sm:$0xff]  }
  0x21   :  { %v1368_v40 = vld [vmem:[%s1644_s0 + $0x40] ss:$16 sps:$4 sm:$0xff]   ;;  %v1374_v45 = vld [vmem:[%s1644_s0 + $0x44] ss:$16 sps:$4 sm:$0xff]   ;;  %v92_v46 = vrot.slane %v1366_v39, %v1535_v37  ;;  %v99_v51 = vrot.slane %v1373_v44, %v1535_v37  ;;  %v1382_v8 = vld [vmem:[#allocation2 + $0x108] sm:$0xff]  }
  0x22   :  { %1212 = vmatpush3.bf16.msra.mxu0 %v1346_v14  ;;  %v1370_v41 = vld [vmem:[%s1644_s0 + $0x60] ss:$16 sps:$4 sm:$0xff]   ;;  %v150_v47 = vrot.slane %v1368_v40, %v1535_v37  ;;  %v1375_v49 = vld [vmem:[%s1644_s0 + $0x64] ss:$16 sps:$4 sm:$0xff]   ;;  %v157_v52 = vrot.slane %v1374_v45, %v1535_v37  ;;  %v1383_v9 = vld [vmem:[#allocation2 + $0x188] sm:$0xff]  }
  0x23   :  { %1234 = vmatpush3.bf16.msra.mxu1 %v1347_v15  ;;  %1213 = vmatprep.subr.bf16.mxu0 %v1348_v16  ;;  %v164_v48 = vrot.slane %v1370_v41, %v1535_v37  ;;  %v101_v54 = vcombine.high %v78_v42, %v92_v46  ;;  %v171_v56 = vrot.slane %v1375_v49, %v1535_v37  ;;  %v1379_v2 = vld [vmem:[#allocation2 + $0x180] sm:$0xff]   ;;  %v1384_v10 = vld [vmem:[#allocation2 + $0x150] sm:$0xff]   ;;  %v1388_v14 = vld [vmem:[#allocation2 + $0x158] sm:$0xff]  }
  0x24   :  { %1235 = vmatprep.subr.bf16.mxu1 %v1349_v17  ;;  %v100_v57 = vcombine.low %v78_v42, %v92_v46  ;;  %v103_v59 = vcombine.high %v85_v50, %v99_v51  ;;  %v102_v61 = vcombine.low %v85_v50, %v99_v51  ;;  %v1385_v11 = vld [vmem:[#allocation2 + $0x1d0] sm:$0xff]   ;;  %v1389_v15 = vld [vmem:[#allocation2 + $0x1d8] sm:$0xff]   ;;  %v1399_v25 = vld [vmem:[#allocation2 + $0x1a8] sm:$0xff]  }
  0x25   :  { %v173_v55 = vcombine.high %v150_v47, %v164_v48  ;;  %v172_v60 = vcombine.low %v150_v47, %v164_v48  ;;  %v175_v0 = vcombine.high %v157_v52, %v171_v56  ;;  %v174_v1 = vcombine.low %v157_v52, %v171_v56  ;;  %v1386_v12 = vld [vmem:[#allocation2 + $0x110] sm:$0xff]   ;;  %v1390_v16 = vld [vmem:[#allocation2 + $0x118] sm:$0xff]  }
  0x26   :  { %1214 = vmatpush3.bf16.msra.mxu0 %v1350_v18  ;;  %v1387_v13 = vld [vmem:[#allocation2 + $0x190] sm:$0xff]   ;;  %v1391_v17 = vld [vmem:[#allocation2 + $0x198] sm:$0xff]   ;;  %v1392_v18 = vld [vmem:[#allocation2 + $0x160] sm:$0xff]  }
  0x27   :  { %1236 = vmatpush3.bf16.msra.mxu1 %v1351_v19  ;;  %1215 = vmatprep.subr.bf16.mxu0 %v1352_v20  ;;  %v229_v63 = vpack.c.bf16 %v173_v55, %v101_v54  ;;  %v228_v3 = vpack.c.bf16 %v172_v60, %v100_v57  ;;  %v231_v5 = vpack.c.bf16 %v175_v0, %v103_v59  ;;  %v1393_v19 = vld [vmem:[#allocation2 + $0x1e0] sm:$0xff]   ;;  %v1400_v26 = vld [vmem:[#allocation2 + $0x170] sm:$0xff]   ;;  %v1406_v32 = vld [vmem:[#allocation2 + $0x138] sm:$0xff]  }
  0x28   :  { %1237 = vmatprep.subr.bf16.mxu1 %v1353_v21  ;;  %v230_v6 = vpack.c.bf16 %v174_v1, %v102_v61  ;;  %v1394_v20 = vld [vmem:[#allocation2 + $0x120] sm:$0xff]   ;;  %v1401_v27 = vld [vmem:[#allocation2 + $0x1f0] sm:$0xff]   ;;  %v1412_v38 = vld [vmem:[%s1644_s0 + $0x48] ss:$16 sps:$4 sm:$0xff]  }
  0x29   :  { %787 = vmatprep.mubr.bf16.mxu0 %v229_v63  ;;  %828 = vmatprep.mubr.bf16.mxu1 %v231_v5  ;;  %v1395_v21 = vld [vmem:[#allocation2 + $0x1a0] sm:$0xff]   ;;  %v1414_v39 = vld [vmem:[%s1644_s0 + $0x68] ss:$16 sps:$4 sm:$0xff]   ;;  %v1416_v40 = vld [vmem:[%s1644_s0 + $0xc] ss:$16 sps:$4 sm:$0xff]   ;;  %v186_v44 = vrot.slane %v1412_v38, %v1535_v37 }
  0x2a   :  { %1216 = vmatpush3.bf16.msra.mxu0 %v1354_v22  ;;  %v1396_v22 = vld [vmem:[#allocation2 + $0x168] sm:$0xff]   ;;  %v200_v47 = vrot.slane %v1414_v39, %v1535_v37  ;;  %v121_v48 = vrot.slane %v1416_v40, %v1535_v37  ;;  %v1420_v0 = vld [vmem:[%s1647_s3] sm:$0xff]  }
  0x2b   :  { %1238 = vmatpush3.bf16.msra.mxu1 %v1355_v23  ;;  %1217 = vmatprep.subr.bf16.mxu0 %v1356_v24  ;;  %v1397_v23 = vld [vmem:[#allocation2 + $0x1e8] sm:$0xff]  }
  0x2c   :  { %1239 = vmatprep.subr.bf16.mxu1 %v1357_v28  ;;  %v1398_v24 = vld [vmem:[#allocation2 + $0x128] sm:$0xff]   ;;  %v1402_v28 = vld [vmem:[#allocation2 + $0x130] sm:$0xff]   ;;  %v209_v54 = vcombine.high %v186_v44, %v200_v47  ;;  %v208_v56 = vcombine.low %v186_v44, %v200_v47 }
  0x2d   :  { %v1417_v41 = vld [vmem:[%s1644_s0 + $0x2c] ss:$16 sps:$4 sm:$0xff]  }
  0x2e   :  { %1218 = vmatpush3.bf16.msra.mxu0 %v1358_v29  ;;  %v1403_v29 = vld [vmem:[#allocation2 + $0x1b0] sm:$0xff]   ;;  %v1418_v45 = vld [vmem:[%s1644_s0 + $0x4c] ss:$16 sps:$4 sm:$0xff]   ;;  %v135_v49 = vrot.slane %v1417_v41, %v1535_v37 }
  0x2f   :  { %1240 = vmatpush3.bf16.msra.mxu1 %v1359_v30  ;;  %1219 = vmatprep.subr.bf16.mxu0 %v1360_v31  ;;  %v1404_v30 = vld [vmem:[#allocation2 + $0x178] sm:$0xff]   ;;  %v193_v51 = vrot.slane %v1418_v45, %v1535_v37  ;;  %v1421_v1 = vld [vmem:[%s1647_s3 + $0x8] sm:$0xff]  }
  0x30   :  { %1241 = vmatprep.subr.bf16.mxu1 %v1361_v34  ;;  %v1405_v31 = vld [vmem:[#allocation2 + $0x1f8] sm:$0xff]   ;;  %v139_v55 = vcombine.high %v121_v48, %v135_v49  ;;  %v138_v57 = vcombine.low %v121_v48, %v135_v49  ;;  %v1425_v5 = vld [vmem:[%s1647_s3 + $0x28] sm:$0xff]  }
  0x31   :  { %v1407_v34 = vld [vmem:[#allocation2 + $0x1b8] sm:$0xff]  }
  0x32   :  { %1220 = vmatpush3.bf16.msra.mxu0 %v1362_v35  ;;  %v1408_v35 = vld [vmem:[%s1644_s0 + $0x8] ss:$16 sps:$4 sm:$0xff]   ;;  %v1419_v46 = vld [vmem:[%s1644_s0 + $0x6c] ss:$16 sps:$4 sm:$0xff]  }
  0x33   :  { %1242 = vmatpush3.bf16.msra.mxu1 %v1363_v36  ;;  %1249 = vmatprep.subr.bf16.mxu0 %v1376_v53  ;;  %v1410_v36 = vld [vmem:[%s1644_s0 + $0x28] ss:$16 sps:$4 sm:$0xff]   ;;  %v114_v42 = vrot.slane %v1408_v35, %v1535_v37  ;;  %v207_v52 = vrot.slane %v1419_v46, %v1535_v37 }
  0x34   :  { %1271 = vmatprep.subr.bf16.mxu1 %v1377_v58  ;;  %v128_v43 = vrot.slane %v1410_v36, %v1535_v37  ;;  %v1484_v37 = vmov 0.0  }
  0x35   :  { %788 = vmatmul.mubr.bf16.vlgmr.msra.gmra.mrb[0].mxu0 %v228_v3  ;;  %v211_v58 = vcombine.high %v193_v51, %v207_v52  ;;  %v210_v59 = vcombine.low %v193_v51, %v207_v52  ;;  %v1423_v3 = vld [vmem:[%s1647_s3 + $0x18] sm:$0xff]  }
  0x36   :  { %1250 = vmatpush3.bf16.msra.mxu0 %v1378_v62  ;;  %829 = vmatmul.mubr.bf16.vlgmr.msra.gmra.mrb[0].mxu1 %v230_v6  ;;  %v137_v50 = vcombine.high %v114_v42, %v128_v43  ;;  %v136_v53 = vcombine.low %v114_v42, %v128_v43  ;;  %v1426_v6 = vld [vmem:[%s1647_s3 + $0x30] sm:$0xff]  }
  0x37   :  { %1251 = vmatprep.subr.bf16.mxu0 %v1380_v4  ;;  %1272 = vmatpush3.bf16.msra.mxu1 %v1379_v2  ;;  %v235_v62 = vpack.c.bf16 %v211_v58, %v139_v55  ;;  %v234_v63 = vpack.c.bf16 %v210_v59, %v138_v57  ;;  %v1422_v2 = vld [vmem:[%s1647_s3 + $0x10] sm:$0xff]   ;;  %v1424_v4 = vld [vmem:[%s1647_s3 + $0x20] sm:$0xff]  }
  0x38   :  { %1273 = vmatprep.subr.bf16.mxu1 %v1381_v7  ;;  %v233_v60 = vpack.c.bf16 %v209_v54, %v137_v50  ;;  %v232_v61 = vpack.c.bf16 %v208_v56, %v136_v53  ;;  %v1427_v7 = vld [vmem:[%s1647_s3 + $0x38] sm:$0xff]   ;;  %v1486_v54 = vmov 1966171168   ;;  %v1191_v57 = vld [vmem:[%s1648_s4] ss:$0 sm:$0xff] }
  0x39   :  { %910 = vmatprep.mubr.bf16.mxu1 %v235_v62  ;;  %v1046_v55 = vunpack.c.l.s4 %v1486_v54 }
  0x3a   :  { %1252 = vmatpush3.bf16.msra.mxu0 %v1382_v8  ;;  %869 = vmatprep.mubr.bf16.mxu0 %v233_v60 }
  0x3b   :  { %1253 = vmatprep.subr.bf16.mxu0 %v1384_v10  ;;  %1274 = vmatpush3.bf16.msra.mxu1 %v1383_v9  ;;  %v1126_v9 = vld [vmem:[%s1646_s2] ss:$0 sm:$0xff]  ;;  %v1047_v56 = vunpack.c.0.s8 %v1046_v55 }
  0x3c   :  { %1275 = vmatprep.subr.bf16.mxu1 %v1385_v11 }
  0x3e   :  { %1254 = vmatpush3.bf16.msra.mxu0 %v1386_v12 }
  0x3f   :  { %1255 = vmatprep.subr.bf16.mxu0 %v1388_v14  ;;  %1276 = vmatpush3.bf16.msra.mxu1 %v1387_v13 }
  0x40   :  { %1277 = vmatprep.subr.bf16.mxu1 %v1389_v15 }
  0x42   :  { %1256 = vmatpush3.bf16.msra.mxu0 %v1390_v16 }
  0x43   :  { %1257 = vmatprep.subr.bf16.mxu0 %v1392_v18  ;;  %1278 = vmatpush3.bf16.msra.mxu1 %v1391_v17 }
  0x44   :  { %1279 = vmatprep.subr.bf16.mxu1 %v1393_v19 }
  0x46   :  { %1258 = vmatpush3.bf16.msra.mxu0 %v1394_v20 }
  0x47   :  { %1259 = vmatprep.subr.bf16.mxu0 %v1396_v22  ;;  %1280 = vmatpush3.bf16.msra.mxu1 %v1395_v21 }
  0x48   :  { %1281 = vmatprep.subr.bf16.mxu1 %v1397_v23 }
  0x4a   :  { %1260 = vmatpush3.bf16.msra.mxu0 %v1398_v24 }
  0x4b   :  { %1261 = vmatprep.subr.bf16.mxu0 %v1400_v26  ;;  %1282 = vmatpush3.bf16.msra.mxu1 %v1399_v25 }
  0x4c   :  { %1283 = vmatprep.subr.bf16.mxu1 %v1401_v27 }
  0x4e   :  { %1262 = vmatpush3.bf16.msra.mxu0 %v1402_v28 }
  0x4f   :  { %1263 = vmatprep.subr.bf16.mxu0 %v1404_v30  ;;  %1284 = vmatpush3.bf16.msra.mxu1 %v1403_v29 }
  0x50   :  { %1285 = vmatprep.subr.bf16.mxu1 %v1405_v31 }
  0x52   :  { %1264 = vmatpush3.bf16.msra.mxu0 %v1406_v32 }
  0x53   :  { %1286 = vmatpush3.bf16.msra.mxu1 %v1407_v34  ;;  %1302 = vmatprep.subr.bf16.mxu0 %v1484_v37 }
  0x55   :  { %870 = vmatmul.mubr.bf16.vlgmr.msra.gmra.mrb[4].mxu0 %v232_v61 }
  0x56   :  { %911 = vmatmul.mubr.bf16.vlgmr.msra.gmra.mrb[4].mxu1 %v234_v63  ;;  %1303 = vmatpush3.bf16.msra.mxu0 %v1420_v0  ;;  %v1050_v63 = vsub.s32 %v1047_v56, %v1532_v33 }
  0x57   :  { %1304 = vmatprep.subr.bf16.mxu0 %v1484_v37  ;;  %1318 = vmatprep.mubr.msk.bf16.mxu0 %vm1485_vm0, %v1484_v37 }
  0x5a   :  { %1305 = vmatpush3.bf16.msra.mxu0 %v1421_v1 }
  0x5b   :  { %1306 = vmatprep.subr.bf16.mxu0 %v1484_v37 }
  0x5e   :  { %1307 = vmatpush3.bf16.msra.mxu0 %v1422_v2 }
  0x5f   :  { %1308 = vmatprep.subr.bf16.mxu0 %v1484_v37 }
  0x62   :  { %1309 = vmatpush3.bf16.msra.mxu0 %v1423_v3 }
  0x63   :  { %1310 = vmatprep.subr.bf16.mxu0 %v1484_v37 }
  0x66   :  { %1311 = vmatpush3.bf16.msra.mxu0 %v1424_v4 }
  0x67   :  { %1312 = vmatprep.subr.bf16.mxu0 %v1484_v37 }
  0x6a   :  { %1313 = vmatpush3.bf16.msra.mxu0 %v1425_v5 }
  0x6b   :  { %1314 = vmatprep.subr.bf16.mxu0 %v1484_v37 }
  0x6e   :  { %1315 = vmatpush3.bf16.msra.mxu0 %v1426_v6 }
  0x6f   :  { %1316 = vmatprep.subr.bf16.mxu0 %v1484_v37 }
  0x72   :  { %1317 = vmatpush3.bf16.msra.mxu0 %v1427_v7 }
 0x108   :  { %v1221_v8 = vpop.f32.mrb[0].mxu0 }
 0x109   :  { %v1222_v10 = vpop.f32.mrb[1].mxu0  ;;  %v1243_v11 = vpop.f32.mrb[0].mxu1 }
 0x10a   :  { %v1223_v12 = vadd.f32 %v1222_v10, %v1221_v8  ;;  %v1224_v13 = vpop.f32.mrb[2].mxu0  ;;  %v1244_v14 = vpop.f32.mrb[1].mxu1 }
 0x10b   :  { %v1225_v15 = vpop.f32.mrb[3].mxu0  ;;  %v1245_v17 = vadd.f32 %v1244_v14, %v1243_v11  ;;  %v1246_v18 = vpop.f32.mrb[2].mxu1 }
 0x10c   :  { %v790_v16 = vadd.f32 %v1223_v12, %v1126_v9  ;;  %v1226_v19 = vadd.f32 %v1225_v15, %v1224_v13  ;;  %v1247_v20 = vpop.f32.mrb[3].mxu1 }
 0x10d   :  { %v1248_v23 = vadd.f32 %v1247_v20, %v1246_v18 }
 0x10e   :  { %v831_v21 = vadd.f32 %v1245_v17, %v790_v16  ;;  %v793_v22 = vadd.f32 %v1226_v19, %v1126_v9 }
 0x110   :  { %v834_v24 = vadd.f32 %v1248_v23, %v793_v22 }
 0x128   :  { %v1265_v25 = vpop.f32.mrb[4].mxu0 }
 0x129   :  { %v1287_v26 = vpop.f32.mrb[4].mxu1  ;;  %v1266_v27 = vpop.f32.mrb[5].mxu0 }
 0x12a   :  { %v1267_v28 = vadd.f32 %v1266_v27, %v1265_v25  ;;  %v1288_v29 = vpop.f32.mrb[5].mxu1  ;;  %v1268_v30 = vpop.f32.mrb[6].mxu0 }
 0x12b   :  { %v1289_v31 = vadd.f32 %v1288_v29, %v1287_v26  ;;  %v1290_v32 = vpop.f32.mrb[6].mxu1  ;;  %v1269_v34 = vpop.f32.mrb[7].mxu0 }
 0x12c   :  { %v872_v35 = vadd.f32 %v1267_v28, %v831_v21  ;;  %v1270_v36 = vadd.f32 %v1269_v34, %v1268_v30  ;;  %v1291_v38 = vpop.f32.mrb[7].mxu1 }
 0x12d   :  { %v1292_v39 = vadd.f32 %v1291_v38, %v1290_v32 }
 0x12e   :  { %v913_v40 = vadd.f32 %v1289_v31, %v872_v35  ;;  %v875_v41 = vadd.f32 %v1270_v36, %v834_v24 }
 0x130   :  { %v921_v42 = vmul.f32 0.70710677, %v913_v40  ;;  %v916_v43 = vadd.f32 %v1292_v39, %v875_v41  ;;  %v919_v48 = vmul.f32 0.5, %v913_v40 }
 0x132   :  { %1428 = verf.f32 %v921_v42  ;;  %v922_v44 = vmul.f32 0.70710677, %v916_v43  ;;  %v920_v49 = vmul.f32 0.5, %v916_v43 }
 0x134   :  { %1430 = verf.f32 %v922_v44 }
 0x13c   :  { %v1429_v45 = vpop.eup %1428 }
 0x13d   :  { %v925_v46 = vadd.f32 1.0, %v1429_v45 }
 0x13e   :  { %v1431_v47 = vpop.eup %1430 }
 0x13f   :  { %v926_v50 = vadd.f32 1.0, %v1431_v47  ;;  %v927_v51 = vmul.f32 %v925_v46, %v919_v48 }
 0x141   :  { %v928_v52 = vmul.f32 %v926_v50, %v920_v49 }
 0x143   :  { %v929_v53 = vpack.c.bf16 %v928_v52, %v927_v51 }
 0x145   :  { %1319 = vmatmul.mubr.bf16.vlgmr.msra.gmra.mrb[8].mxu0 %v929_v53 }
 0x218   :  { %v1035_v58 = vpop.f32.mrb[8].mxu0 }
 0x219   :  { %v1320_v59 = vpop.f32.mrb[9].mxu0  ;;  %v1036_v61 = vadd.f32 %v1191_v57, %v1035_v58 }
 0x21a   :  { %v1038_v60 = vpop.f32.mrb[10].mxu0 }
 0x21b   :  { %v1039_v62 = vadd.f32 %v1191_v57, %v1038_v60  ;;  %v1321_v0 = vpop.f32.mrb[11].mxu0 }
 0x21d   :  { %v1042_v37 = vpack.c.bf16 %v1039_v62, %v1036_v61  ;;  %v1200_v1 = vpack.c.bf16 %v1039_v62, %v1039_v62 }
 0x21f   :  { %v1051_v2 = vrot.slane %v1042_v37, %v1050_v63  ;;  %v1058_v3 = vrot.slane %v1200_v1, %v1050_v63 }
 0x221   :  { %v1059_v4 = vcombine.high %v1051_v2, %v1051_v2  ;;  %v1060_v5 = vcombine.high %v1058_v3, %v1058_v3  ;;  %v1067_v6 = vrot.slane %v1051_v2, %v1050_v63  ;;  %v1074_v7 = vrot.slane %v1058_v3, %v1050_v63  ;;  %1201 = vst.sshfl [vmem:[#allocation5] sm:$0x1 pattern:$0x73625140] %v1051_v2 }
 0x222   :  { %1203 = vst.sshfl [vmem:[#allocation5 + $0x4] sm:$0x1 pattern:$0x73625140] %v1058_v3 }
 0x223   :  { %v1081_v8 = vrot.slane %v1059_v4, %v1050_v63  ;;  %v1088_v9 = vrot.slane %v1060_v5, %v1050_v63  ;;  %v1089_v10 = vcombine.high %v1067_v6, %v1067_v6  ;;  %v1090_v11 = vcombine.high %v1074_v7, %v1074_v7  ;;  %1202 = vst.sshfl [vmem:[#allocation5 + $0x1] sm:$0x1 pattern:$0x73625140] %v1059_v4 }
 0x224   :  { %1204 = vst.sshfl [vmem:[#allocation5 + $0x5] sm:$0x1 pattern:$0x73625140] %v1060_v5 }
 0x225   :  { %v1091_v12 = vcombine.high %v1081_v8, %v1081_v8  ;;  %v1092_v13 = vcombine.high %v1088_v9, %v1088_v9  ;;  %1103 = vst [vmem:[#allocation5 + $0x2] sm:$0x1] %v1089_v10  ;;  %1107 = vst [vmem:[#allocation5 + $0x6] sm:$0x1] %v1090_v11 }
 0x227   :  { %1104 = vst [vmem:[#allocation5 + $0x3] sm:$0x1] %v1091_v12  ;;  %1108 = vst [vmem:[#allocation5 + $0x7] sm:$0x1] %v1092_v13 }
 0x228   :  { %1113 = vsyncadd [#allocation4], 112  ;;  %s1487_s4 = smov [#allocation5]  }
 0x229   :  { %s1114_s29 = sshll.u32 %s1487_s4, 4  ;;  %s1115_s29 = int_to_ptr.vmem [resolvable:$true] %s1114_s29 }
 0x22a   :  { %s1454_s30 = scalar_lea.vmem %s1115_s29, 16  ;;  %s1458_s6 = scalar_lea.vmem %s1115_s29, 128 }
 0x22b   :  { %p1455_p8 = scmp.ne.s32.totalorder %s1115_s29, %s1454_s30  ;;  %p1459_p9 = scmp.lt.s32.totalorder %s1115_s29, %s1115_s29 }
 0x22c   :  { %p1460_p10 = scmp.lt.s32.totalorder %s1458_s6, %s1454_s30 }
 0x22e   :  { %p1461_p11 = por %p1460_p10, %p1459_p9 }
 0x230   :  { %p1462_p12 = pnand %p1461_p11, %p1455_p8 }
 0x232   :  { %1465 = shalt.err (!%p1462_p12)
}
 0x233   :  { %s1466_s8 = scalar_lea.hbm %s1649_s5, 16 }
 0x234   :  { %p1467_p13 = scmp.ne.s32.totalorder %s1649_s5, %s1466_s8  ;;  %p1470_p0 = scmp.lt.u32.totalorder %s1466_s8, %s1649_s5 }
 0x236   :  { %p1472_p1 = pnand %p1470_p0, %p1467_p13 }
 0x238   :  { %1475 = shalt.err (!%p1472_p1)
}
 0x239   :  { %s1488_s12 = smov 16   ;;  %s1489_s13 = smov 1  }
 0x23a   :  { %1120 = dma.vmem_to_hbm [thread:$0]  %s1115_s29, 16, %s1649_s5, [#allocation4], %s1488_s12, %s1488_s12, %s1489_s13  }
 0x23b   :  { %1478 = dma.done.wait [#allocation4], 128  }
 0x23c   :  { %1479 = vsyncadd [#allocation4], 4294967168 }
 0x23d   :  { %1124 = vsyncpa [#allocation3], 1 }
 0x23e   :  { %1125 = vsyncpa [#allocation4], 1 }

</bundles_post_ra>
